<compile_context>
chip_gen: v6e
topology: v6e:2x2x1
jax: 0.10.0
libtpu: 0.0.40
codegen_flags: <defaults>
</compile_context>

<pallas_src>
import functools

import jax
import jax.numpy as jnp
import numpy as np
from jax.experimental import pallas as pl
from jax.experimental.pallas import tpu as pltpu

LANE = 128  # lane-aligned stride for each weight block in the slab


def decoder_kernel(x_ref, h0_ref, ctx_ref, w_ref, aux_ref, u_ref):
    B, H = h0_ref.shape
    TB = x_ref.shape[0]
    T = TB // B
    BS = ctx_ref.shape[0]
    S = BS // B
    P = LANE

    # ---- GRU (num_layers=1, batch_first) over T steps.
    # Hoisted: all input-gate pre-activations in one matmul.  Gate biases are folded
    # via the ones column of x (row H of the slab is the bias row); each gate lives
    # in its own 128-lane block so every slice below is vreg-aligned (no lane rolls).
    gi = jnp.dot(x_ref[...], w_ref[:, 0:3 * P],
                 preferred_element_type=jnp.float32)               # (T*B, 3P)
    wh = w_ref[0:H, 3 * P:6 * P]                                   # (H, 3P) fused recurrent weights
    bhn = aux_ref[0:1, 0:H]                                        # (1, H)

    h = h0_ref[...]                                                # (B, H), carried in vregs
    for t in range(T):                                             # T small & static -> unrolled
        gi_t = gi[t * B:(t + 1) * B, :]                            # sublane-aligned row slice
        gh = jnp.dot(h, wh, preferred_element_type=jnp.float32)    # (B, 3P), one MXU push/step
        r = jax.nn.sigmoid(gi_t[:, 0:H] + gh[:, 0:H])
        z = jax.nn.sigmoid(gi_t[:, P:P + H] + gh[:, P:P + H])
        n = jnp.tanh(gi_t[:, 2 * P:2 * P + H] + r * (gh[:, 2 * P:2 * P + H] + bhn))
        h = (1.0 - z) * n + z * h
    # h == gru hidden_state[0], shape (B, H)

    # ---- Attention (pointer scores).  W1/W2 blocks are zero-padded to 128 lanes,
    # so the pad lanes contribute tanh(0)*0 = 0 to the lane reduction.
    enc = jnp.dot(ctx_ref[...], w_ref[0:H, 6 * P:7 * P],
                  preferred_element_type=jnp.float32)              # (B*S, P) = W1(context)
    dec = jnp.dot(h, w_ref[0:H, 7 * P:8 * P],
                  preferred_element_type=jnp.float32)              # (B, P)   = W2(hidden)[0]
    # PyTorch broadcast of (B,S,H) + (1,1,B,H): act[i,j,:] = enc[i,j,:] + dec[j,:]
    # (valid only when S == B, exactly as required by the reference module).
    act = jnp.tanh(enc.reshape(B, S, P) + dec[None, :, :])         # (B, S, P)
    vt = aux_ref[1:2, :]                                           # (1, P), zero beyond H
    # vt projection as VPU multiply + lane reduction (avoids a 1-wide MXU output).
    u_ref[...] = jnp.sum(act * vt[None, :, :], axis=-1)            # (B, S)


def decoder_forward(params, embedded_inputs, decoder_input, hidden, context):
    """Pallas port of Decoder.forward.  `embedded_inputs` is unused, as in PyTorch."""
    del embedded_inputs
    B, T, H = decoder_input.shape
    _, S, _ = context.shape
    if not (S == B or B == 1):
        raise ValueError("PyTorch broadcasting in Attention requires S == B (or B == 1).")
    P = LANE
    KA = ((H + 1 + 7) // 8) * 8                     # contraction dim padded to sublane multiple

    # Time-major, flattened, with a ones column (at col H) folding the gate biases
    # into the hoisted input matmul.  Cols H+1..KA-1 are zero padding.
    x_tm = jnp.transpose(decoder_input, (1, 0, 2)).reshape(T * B, H).astype(jnp.float32)
    x_aug = jnp.zeros((T * B, KA), jnp.float32)
    x_aug = x_aug.at[:, 0:H].set(x_tm)
    x_aug = x_aug.at[:, H].set(1.0)

    h0 = hidden[0].astype(jnp.float32)                              # (B, H)
    ctx2d = context.reshape(B * S, H).astype(jnp.float32)           # (B*S, H)

    w_ih = params["w_ih"].astype(jnp.float32)      # (3H, H), gate order r, z, n
    w_hh = params["w_hh"].astype(jnp.float32)      # (3H, H)
    b_ih = params["b_ih"].astype(jnp.float32)      # (3H,)
    b_hh = params["b_hh"].astype(jnp.float32)      # (3H,)

    def pad_block(w_t, bias=None):
        # w_t: (H, H) column block -> (KA, P), weight in rows 0:H, optional bias in row H.
        blk = jnp.zeros((KA, P), jnp.float32)
        blk = blk.at[0:H, 0:H].set(w_t)
        if bias is not None:
            blk = blk.at[H, 0:H].set(bias)
        return blk

    # Fold biases: r and z gates get (b_i + b_h); n gate gets only b_in here,
    # b_hn stays separate because it is scaled by r inside the cell.
    blocks = [
        pad_block(w_ih[0:H].T,          b_ih[0:H] + b_hh[0:H]),
        pad_block(w_ih[H:2 * H].T,      b_ih[H:2 * H] + b_hh[H:2 * H]),
        pad_block(w_ih[2 * H:3 * H].T,  b_ih[2 * H:3 * H]),
        pad_block(w_hh[0:H].T),
        pad_block(w_hh[H:2 * H].T),
        pad_block(w_hh[2 * H:3 * H].T),
        pad_block(params["W1"].T.astype(jnp.float32)),
        pad_block(params["W2"].T.astype(jnp.float32)),
    ]
    w_slab = jnp.concatenate(blocks, axis=1)                        # (KA, 8*P)

    aux = jnp.zeros((2, P), jnp.float32)
    aux = aux.at[0, 0:H].set(b_hh[2 * H:3 * H])                     # b_hn
    aux = aux.at[1, 0:H].set(params["vt"][0].astype(jnp.float32))   # vt row

    flops = 2 * (T * B * KA * 3 * P          # hoisted input-gate matmul
                 + T * B * H * 3 * P         # recurrent matmuls
                 + B * S * H * P             # W1(context)
                 + B * H * P)                # W2(hidden)
    transcendentals = 3 * T * B * H + B * S * P
    bytes_accessed = 4 * (x_aug.size + h0.size + ctx2d.size + w_slab.size + aux.size + B * S)

    u = pl.pallas_call(
        decoder_kernel,
        out_shape=jax.ShapeDtypeStruct((B, S), jnp.float32),
        in_specs=[pl.BlockSpec(memory_space=pltpu.MemorySpace.VMEM)] * 5,
        out_specs=pl.BlockSpec(memory_space=pltpu.MemorySpace.VMEM),
        cost_estimate=pl.CostEstimate(flops=int(flops),
                                      transcendentals=int(transcendentals),
                                      bytes_accessed=int(bytes_accessed)),
    )(x_aug, h0, ctx2d, w_slab, aux)

    # nn.Softmax() with dim=None on the 3-D u_i (1, B, S) picks dim=0 (size 1) -> all ones.
    # Built directly in the wrapper: no kernel output buffer / store / DMA needed.
    log_score = jnp.ones((1, B, S), jnp.float32)
    return log_score, u


def ref_forward(params, embedded_inputs, decoder_input, hidden, context):
    """Pure-JAX mirror of the PyTorch module (for correctness checking)."""
    del embedded_inputs
    w_ih, w_hh = params["w_ih"], params["w_hh"]
    b_ih, b_hh = params["b_ih"], params["b_hh"]
    H = w_hh.shape[1]

    def cell(h, x):
        gi = x @ w_ih.T + b_ih
        gh = h @ w_hh.T + b_hh
        i_r, i_z, i_n = jnp.split(gi, 3, axis=-1)
        h_r, h_z, h_n = jnp.split(gh, 3, axis=-1)
        r = jax.nn.sigmoid(i_r + h_r)
        z = jax.nn.sigmoid(i_z + h_z)
        n = jnp.tanh(i_n + r * h_n)
        return (1.0 - z) * n + z * h, None

    xs = jnp.transpose(decoder_input, (1, 0, 2))
    h_final, _ = jax.lax.scan(cell, hidden[0], xs)
    hidden_state = h_final[None]                          # (1, B, H)

    enc = context @ params["W1"].T                        # (B, S, H)
    dec = (hidden_state @ params["W2"].T)[:, None]        # (1, 1, B, H)
    u = (jnp.tanh(enc + dec) @ params["vt"].T)[..., 0]    # (1, B, S)   (needs S == B)
    log_score = jax.nn.softmax(u, axis=0)                 # nn.Softmax() default dim for 3-D
    return log_score, u[0]


if __name__ == "__main__":
    # S must equal B for the PyTorch broadcast in Attention to be valid.
    B, S, T, H, E = 8, 8, 6, 32, 16
    key = jax.random.PRNGKey(0)
    keys = jax.random.split(key, 12)
    scale = 1.0 / np.sqrt(H)

    def uinit(k, shape):
        return jax.random.uniform(k, shape, jnp.float32, -scale, scale)

    params = {
        "w_ih": uinit(keys[0], (3 * H, H)),
        "w_hh": uinit(keys[1], (3 * H, H)),
        "b_ih": uinit(keys[2], (3 * H,)),
        "b_hh": uinit(keys[3], (3 * H,)),
        "W1": uinit(keys[4], (H, H)),
        "W2": uinit(keys[5], (H, H)),
        "vt": uinit(keys[6], (1, H)),
    }

    embedded_inputs = jax.random.normal(keys[7], (B, S, E), jnp.float32)  # unused by forward
    decoder_input = jax.random.normal(keys[8], (B, T, H), jnp.float32)
    hidden = jax.random.normal(keys[9], (1, B, H), jnp.float32)
    context = jax.random.normal(keys[10], (B, S, H), jnp.float32)

    fwd = jax.jit(functools.partial(decoder_forward, params))
    log_score, u_i = fwd(embedded_inputs, decoder_input, hidden, context)
    jax.block_until_ready((log_score, u_i))

    ref_score, ref_u = ref_forward(params, embedded_inputs, decoder_input, hidden, context)

    assert log_score.shape == (1, B, S)
    np.testing.assert_allclose(np.asarray(log_score), np.asarray(ref_score),
                               rtol=1e-5, atol=1e-5)
    np.testing.assert_allclose(np.asarray(u_i), np.asarray(ref_u), rtol=1e-3, atol=1e-3)
    print("KERNEL_OK")
</pallas_src>

<mosaic_0001>
module attributes {stable_mosaic.version = 11 : i64} {
  func.func @decoder_kernel(%arg0: memref<48x40xf32, #tpu.memory_space<vmem>>, %arg1: memref<8x32xf32, #tpu.memory_space<vmem>>, %arg2: memref<64x32xf32, #tpu.memory_space<vmem>>, %arg3: memref<40x1024xf32, #tpu.memory_space<vmem>>, %arg4: memref<2x128xf32, #tpu.memory_space<vmem>>, %arg5: memref<8x8xf32, #tpu.memory_space<vmem>>) attributes {dimension_semantics = [], scalar_prefetch = 0 : i64, scratch_operands = 0 : i64, tpu.core_type = #tpu.core_type<tc>} {
    %c0 = arith.constant 0 : index
    %c0_0 = arith.constant 0 : index
    %0 = vector.load %arg0[%c0, %c0_0] : memref<48x40xf32, #tpu.memory_space<vmem>>, vector<48x40xf32>
    %c0_1 = arith.constant 0 : index
    %c0_2 = arith.constant 0 : index
    %1 = vector.load %arg3[%c0_1, %c0_2] : memref<40x1024xf32, #tpu.memory_space<vmem>>, vector<40x384xf32>
    %cst = arith.constant dense<0.000000e+00> : vector<48x384xf32>
    %2 = tpu.matmul %0, %1, %cst {dimension_numbers = #tpu.dot_dimension_numbers<[1], [0], [0], [1], [0, 0, 1, 1], [], []>} : vector<48x40xf32>, vector<40x384xf32>, vector<48x384xf32> -> vector<48x384xf32>
    %c0_3 = arith.constant 0 : index
    %c384 = arith.constant 384 : index
    %3 = vector.load %arg3[%c0_3, %c384] : memref<40x1024xf32, #tpu.memory_space<vmem>>, vector<32x384xf32>
    %c0_4 = arith.constant 0 : index
    %c0_5 = arith.constant 0 : index
    %4 = vector.load %arg4[%c0_4, %c0_5] : memref<2x128xf32, #tpu.memory_space<vmem>>, vector<1x32xf32>
    %c0_6 = arith.constant 0 : index
    %c0_7 = arith.constant 0 : index
    %5 = vector.load %arg1[%c0_6, %c0_7] : memref<8x32xf32, #tpu.memory_space<vmem>>, vector<8x32xf32>
    %6 = vector.extract_strided_slice %2 {offsets = [0, 0], sizes = [8, 384], strides = [1, 1]} : vector<48x384xf32> to vector<8x384xf32>
    %cst_8 = arith.constant dense<0.000000e+00> : vector<8x384xf32>
    %7 = tpu.matmul %5, %3, %cst_8 {dimension_numbers = #tpu.dot_dimension_numbers<[1], [0], [0], [1], [0, 0, 1, 1], [], []>} : vector<8x32xf32>, vector<32x384xf32>, vector<8x384xf32> -> vector<8x384xf32>
    %8 = vector.extract_strided_slice %6 {offsets = [0, 0], sizes = [8, 32], strides = [1, 1]} : vector<8x384xf32> to vector<8x32xf32>
    %9 = vector.extract_strided_slice %7 {offsets = [0, 0], sizes = [8, 32], strides = [1, 1]} : vector<8x384xf32> to vector<8x32xf32>
    %10 = arith.addf %8, %9 : vector<8x32xf32>
    %11 = arith.negf %10 : vector<8x32xf32>
    %12 = math.exp %11 : vector<8x32xf32>
    %cst_9 = arith.constant 1.000000e+00 : f32
    %13 = vector.broadcast %cst_9 : f32 to vector<8x32xf32>
    %14 = arith.addf %13, %12 : vector<8x32xf32>
    %15 = arith.divf %13, %14 : vector<8x32xf32>
    %16 = vector.extract_strided_slice %6 {offsets = [0, 128], sizes = [8, 32], strides = [1, 1]} : vector<8x384xf32> to vector<8x32xf32>
    %17 = vector.extract_strided_slice %7 {offsets = [0, 128], sizes = [8, 32], strides = [1, 1]} : vector<8x384xf32> to vector<8x32xf32>
    %18 = arith.addf %16, %17 : vector<8x32xf32>
    %19 = arith.negf %18 : vector<8x32xf32>
    %20 = math.exp %19 : vector<8x32xf32>
    %cst_10 = arith.constant 1.000000e+00 : f32
    %21 = vector.broadcast %cst_10 : f32 to vector<8x32xf32>
    %22 = arith.addf %21, %20 : vector<8x32xf32>
    %23 = arith.divf %21, %22 : vector<8x32xf32>
    %24 = vector.extract_strided_slice %6 {offsets = [0, 256], sizes = [8, 32], strides = [1, 1]} : vector<8x384xf32> to vector<8x32xf32>
    %25 = vector.extract_strided_slice %7 {offsets = [0, 256], sizes = [8, 32], strides = [1, 1]} : vector<8x384xf32> to vector<8x32xf32>
    %26 = vector.broadcast %4 : vector<1x32xf32> to vector<8x32xf32>
    %27 = arith.addf %25, %26 : vector<8x32xf32>
    %28 = arith.mulf %15, %27 : vector<8x32xf32>
    %29 = arith.addf %24, %28 : vector<8x32xf32>
    %30 = math.tanh %29 : vector<8x32xf32>
    %cst_11 = arith.constant 1.000000e+00 : f32
    %31 = vector.broadcast %cst_11 : f32 to vector<8x32xf32>
    %32 = arith.subf %31, %23 : vector<8x32xf32>
    %33 = arith.mulf %32, %30 : vector<8x32xf32>
    %34 = arith.mulf %23, %5 : vector<8x32xf32>
    %35 = arith.addf %33, %34 : vector<8x32xf32>
    %36 = vector.extract_strided_slice %2 {offsets = [8, 0], sizes = [8, 384], strides = [1, 1]} : vector<48x384xf32> to vector<8x384xf32>
    %cst_12 = arith.constant dense<0.000000e+00> : vector<8x384xf32>
    %37 = tpu.matmul %35, %3, %cst_12 {dimension_numbers = #tpu.dot_dimension_numbers<[1], [0], [0], [1], [0, 0, 1, 1], [], []>} : vector<8x32xf32>, vector<32x384xf32>, vector<8x384xf32> -> vector<8x384xf32>
    %38 = vector.extract_strided_slice %36 {offsets = [0, 0], sizes = [8, 32], strides = [1, 1]} : vector<8x384xf32> to vector<8x32xf32>
    %39 = vector.extract_strided_slice %37 {offsets = [0, 0], sizes = [8, 32], strides = [1, 1]} : vector<8x384xf32> to vector<8x32xf32>
    %40 = arith.addf %38, %39 : vector<8x32xf32>
    %41 = arith.negf %40 : vector<8x32xf32>
    %42 = math.exp %41 : vector<8x32xf32>
    %cst_13 = arith.constant 1.000000e+00 : f32
    %43 = vector.broadcast %cst_13 : f32 to vector<8x32xf32>
    %44 = arith.addf %43, %42 : vector<8x32xf32>
    %45 = arith.divf %43, %44 : vector<8x32xf32>
    %46 = vector.extract_strided_slice %36 {offsets = [0, 128], sizes = [8, 32], strides = [1, 1]} : vector<8x384xf32> to vector<8x32xf32>
    %47 = vector.extract_strided_slice %37 {offsets = [0, 128], sizes = [8, 32], strides = [1, 1]} : vector<8x384xf32> to vector<8x32xf32>
    %48 = arith.addf %46, %47 : vector<8x32xf32>
    %49 = arith.negf %48 : vector<8x32xf32>
    %50 = math.exp %49 : vector<8x32xf32>
    %cst_14 = arith.constant 1.000000e+00 : f32
    %51 = vector.broadcast %cst_14 : f32 to vector<8x32xf32>
    %52 = arith.addf %51, %50 : vector<8x32xf32>
    %53 = arith.divf %51, %52 : vector<8x32xf32>
    %54 = vector.extract_strided_slice %36 {offsets = [0, 256], sizes = [8, 32], strides = [1, 1]} : vector<8x384xf32> to vector<8x32xf32>
    %55 = vector.extract_strided_slice %37 {offsets = [0, 256], sizes = [8, 32], strides = [1, 1]} : vector<8x384xf32> to vector<8x32xf32>
    %56 = vector.broadcast %4 : vector<1x32xf32> to vector<8x32xf32>
    %57 = arith.addf %55, %56 : vector<8x32xf32>
    %58 = arith.mulf %45, %57 : vector<8x32xf32>
    %59 = arith.addf %54, %58 : vector<8x32xf32>
    %60 = math.tanh %59 : vector<8x32xf32>
    %cst_15 = arith.constant 1.000000e+00 : f32
    %61 = vector.broadcast %cst_15 : f32 to vector<8x32xf32>
    %62 = arith.subf %61, %53 : vector<8x32xf32>
    %63 = arith.mulf %62, %60 : vector<8x32xf32>
    %64 = arith.mulf %53, %35 : vector<8x32xf32>
    %65 = arith.addf %63, %64 : vector<8x32xf32>
    %66 = vector.extract_strided_slice %2 {offsets = [16, 0], sizes = [8, 384], strides = [1, 1]} : vector<48x384xf32> to vector<8x384xf32>
    %cst_16 = arith.constant dense<0.000000e+00> : vector<8x384xf32>
    %67 = tpu.matmul %65, %3, %cst_16 {dimension_numbers = #tpu.dot_dimension_numbers<[1], [0], [0], [1], [0, 0, 1, 1], [], []>} : vector<8x32xf32>, vector<32x384xf32>, vector<8x384xf32> -> vector<8x384xf32>
    %68 = vector.extract_strided_slice %66 {offsets = [0, 0], sizes = [8, 32], strides = [1, 1]} : vector<8x384xf32> to vector<8x32xf32>
    %69 = vector.extract_strided_slice %67 {offsets = [0, 0], sizes = [8, 32], strides = [1, 1]} : vector<8x384xf32> to vector<8x32xf32>
    %70 = arith.addf %68, %69 : vector<8x32xf32>
    %71 = arith.negf %70 : vector<8x32xf32>
    %72 = math.exp %71 : vector<8x32xf32>
    %cst_17 = arith.constant 1.000000e+00 : f32
    %73 = vector.broadcast %cst_17 : f32 to vector<8x32xf32>
    %74 = arith.addf %73, %72 : vector<8x32xf32>
    %75 = arith.divf %73, %74 : vector<8x32xf32>
    %76 = vector.extract_strided_slice %66 {offsets = [0, 128], sizes = [8, 32], strides = [1, 1]} : vector<8x384xf32> to vector<8x32xf32>
    %77 = vector.extract_strided_slice %67 {offsets = [0, 128], sizes = [8, 32], strides = [1, 1]} : vector<8x384xf32> to vector<8x32xf32>
    %78 = arith.addf %76, %77 : vector<8x32xf32>
    %79 = arith.negf %78 : vector<8x32xf32>
    %80 = math.exp %79 : vector<8x32xf32>
    %cst_18 = arith.constant 1.000000e+00 : f32
    %81 = vector.broadcast %cst_18 : f32 to vector<8x32xf32>
    %82 = arith.addf %81, %80 : vector<8x32xf32>
    %83 = arith.divf %81, %82 : vector<8x32xf32>
    %84 = vector.extract_strided_slice %66 {offsets = [0, 256], sizes = [8, 32], strides = [1, 1]} : vector<8x384xf32> to vector<8x32xf32>
    %85 = vector.extract_strided_slice %67 {offsets = [0, 256], sizes = [8, 32], strides = [1, 1]} : vector<8x384xf32> to vector<8x32xf32>
    %86 = vector.broadcast %4 : vector<1x32xf32> to vector<8x32xf32>
    %87 = arith.addf %85, %86 : vector<8x32xf32>
    %88 = arith.mulf %75, %87 : vector<8x32xf32>
    %89 = arith.addf %84, %88 : vector<8x32xf32>
    %90 = math.tanh %89 : vector<8x32xf32>
    %cst_19 = arith.constant 1.000000e+00 : f32
    %91 = vector.broadcast %cst_19 : f32 to vector<8x32xf32>
    %92 = arith.subf %91, %83 : vector<8x32xf32>
    %93 = arith.mulf %92, %90 : vector<8x32xf32>
    %94 = arith.mulf %83, %65 : vector<8x32xf32>
    %95 = arith.addf %93, %94 : vector<8x32xf32>
    %96 = vector.extract_strided_slice %2 {offsets = [24, 0], sizes = [8, 384], strides = [1, 1]} : vector<48x384xf32> to vector<8x384xf32>
    %cst_20 = arith.constant dense<0.000000e+00> : vector<8x384xf32>
    %97 = tpu.matmul %95, %3, %cst_20 {dimension_numbers = #tpu.dot_dimension_numbers<[1], [0], [0], [1], [0, 0, 1, 1], [], []>} : vector<8x32xf32>, vector<32x384xf32>, vector<8x384xf32> -> vector<8x384xf32>
    %98 = vector.extract_strided_slice %96 {offsets = [0, 0], sizes = [8, 32], strides = [1, 1]} : vector<8x384xf32> to vector<8x32xf32>
    %99 = vector.extract_strided_slice %97 {offsets = [0, 0], sizes = [8, 32], strides = [1, 1]} : vector<8x384xf32> to vector<8x32xf32>
    %100 = arith.addf %98, %99 : vector<8x32xf32>
    %101 = arith.negf %100 : vector<8x32xf32>
    %102 = math.exp %101 : vector<8x32xf32>
    %cst_21 = arith.constant 1.000000e+00 : f32
    %103 = vector.broadcast %cst_21 : f32 to vector<8x32xf32>
    %104 = arith.addf %103, %102 : vector<8x32xf32>
    %105 = arith.divf %103, %104 : vector<8x32xf32>
    %106 = vector.extract_strided_slice %96 {offsets = [0, 128], sizes = [8, 32], strides = [1, 1]} : vector<8x384xf32> to vector<8x32xf32>
    %107 = vector.extract_strided_slice %97 {offsets = [0, 128], sizes = [8, 32], strides = [1, 1]} : vector<8x384xf32> to vector<8x32xf32>
    %108 = arith.addf %106, %107 : vector<8x32xf32>
    %109 = arith.negf %108 : vector<8x32xf32>
    %110 = math.exp %109 : vector<8x32xf32>
    %cst_22 = arith.constant 1.000000e+00 : f32
    %111 = vector.broadcast %cst_22 : f32 to vector<8x32xf32>
    %112 = arith.addf %111, %110 : vector<8x32xf32>
    %113 = arith.divf %111, %112 : vector<8x32xf32>
    %114 = vector.extract_strided_slice %96 {offsets = [0, 256], sizes = [8, 32], strides = [1, 1]} : vector<8x384xf32> to vector<8x32xf32>
    %115 = vector.extract_strided_slice %97 {offsets = [0, 256], sizes = [8, 32], strides = [1, 1]} : vector<8x384xf32> to vector<8x32xf32>
    %116 = vector.broadcast %4 : vector<1x32xf32> to vector<8x32xf32>
    %117 = arith.addf %115, %116 : vector<8x32xf32>
    %118 = arith.mulf %105, %117 : vector<8x32xf32>
    %119 = arith.addf %114, %118 : vector<8x32xf32>
    %120 = math.tanh %119 : vector<8x32xf32>
    %cst_23 = arith.constant 1.000000e+00 : f32
    %121 = vector.broadcast %cst_23 : f32 to vector<8x32xf32>
    %122 = arith.subf %121, %113 : vector<8x32xf32>
    %123 = arith.mulf %122, %120 : vector<8x32xf32>
    %124 = arith.mulf %113, %95 : vector<8x32xf32>
    %125 = arith.addf %123, %124 : vector<8x32xf32>
    %126 = vector.extract_strided_slice %2 {offsets = [32, 0], sizes = [8, 384], strides = [1, 1]} : vector<48x384xf32> to vector<8x384xf32>
    %cst_24 = arith.constant dense<0.000000e+00> : vector<8x384xf32>
    %127 = tpu.matmul %125, %3, %cst_24 {dimension_numbers = #tpu.dot_dimension_numbers<[1], [0], [0], [1], [0, 0, 1, 1], [], []>} : vector<8x32xf32>, vector<32x384xf32>, vector<8x384xf32> -> vector<8x384xf32>
    %128 = vector.extract_strided_slice %126 {offsets = [0, 0], sizes = [8, 32], strides = [1, 1]} : vector<8x384xf32> to vector<8x32xf32>
    %129 = vector.extract_strided_slice %127 {offsets = [0, 0], sizes = [8, 32], strides = [1, 1]} : vector<8x384xf32> to vector<8x32xf32>
    %130 = arith.addf %128, %129 : vector<8x32xf32>
    %131 = arith.negf %130 : vector<8x32xf32>
    %132 = math.exp %131 : vector<8x32xf32>
    %cst_25 = arith.constant 1.000000e+00 : f32
    %133 = vector.broadcast %cst_25 : f32 to vector<8x32xf32>
    %134 = arith.addf %133, %132 : vector<8x32xf32>
    %135 = arith.divf %133, %134 : vector<8x32xf32>
    %136 = vector.extract_strided_slice %126 {offsets = [0, 128], sizes = [8, 32], strides = [1, 1]} : vector<8x384xf32> to vector<8x32xf32>
    %137 = vector.extract_strided_slice %127 {offsets = [0, 128], sizes = [8, 32], strides = [1, 1]} : vector<8x384xf32> to vector<8x32xf32>
    %138 = arith.addf %136, %137 : vector<8x32xf32>
    %139 = arith.negf %138 : vector<8x32xf32>
    %140 = math.exp %139 : vector<8x32xf32>
    %cst_26 = arith.constant 1.000000e+00 : f32
    %141 = vector.broadcast %cst_26 : f32 to vector<8x32xf32>
    %142 = arith.addf %141, %140 : vector<8x32xf32>
    %143 = arith.divf %141, %142 : vector<8x32xf32>
    %144 = vector.extract_strided_slice %126 {offsets = [0, 256], sizes = [8, 32], strides = [1, 1]} : vector<8x384xf32> to vector<8x32xf32>
    %145 = vector.extract_strided_slice %127 {offsets = [0, 256], sizes = [8, 32], strides = [1, 1]} : vector<8x384xf32> to vector<8x32xf32>
    %146 = vector.broadcast %4 : vector<1x32xf32> to vector<8x32xf32>
    %147 = arith.addf %145, %146 : vector<8x32xf32>
    %148 = arith.mulf %135, %147 : vector<8x32xf32>
    %149 = arith.addf %144, %148 : vector<8x32xf32>
    %150 = math.tanh %149 : vector<8x32xf32>
    %cst_27 = arith.constant 1.000000e+00 : f32
    %151 = vector.broadcast %cst_27 : f32 to vector<8x32xf32>
    %152 = arith.subf %151, %143 : vector<8x32xf32>
    %153 = arith.mulf %152, %150 : vector<8x32xf32>
    %154 = arith.mulf %143, %125 : vector<8x32xf32>
    %155 = arith.addf %153, %154 : vector<8x32xf32>
    %156 = vector.extract_strided_slice %2 {offsets = [40, 0], sizes = [8, 384], strides = [1, 1]} : vector<48x384xf32> to vector<8x384xf32>
    %cst_28 = arith.constant dense<0.000000e+00> : vector<8x384xf32>
    %157 = tpu.matmul %155, %3, %cst_28 {dimension_numbers = #tpu.dot_dimension_numbers<[1], [0], [0], [1], [0, 0, 1, 1], [], []>} : vector<8x32xf32>, vector<32x384xf32>, vector<8x384xf32> -> vector<8x384xf32>
    %158 = vector.extract_strided_slice %156 {offsets = [0, 0], sizes = [8, 32], strides = [1, 1]} : vector<8x384xf32> to vector<8x32xf32>
    %159 = vector.extract_strided_slice %157 {offsets = [0, 0], sizes = [8, 32], strides = [1, 1]} : vector<8x384xf32> to vector<8x32xf32>
    %160 = arith.addf %158, %159 : vector<8x32xf32>
    %161 = arith.negf %160 : vector<8x32xf32>
    %162 = math.exp %161 : vector<8x32xf32>
    %cst_29 = arith.constant 1.000000e+00 : f32
    %163 = vector.broadcast %cst_29 : f32 to vector<8x32xf32>
    %164 = arith.addf %163, %162 : vector<8x32xf32>
    %165 = arith.divf %163, %164 : vector<8x32xf32>
    %166 = vector.extract_strided_slice %156 {offsets = [0, 128], sizes = [8, 32], strides = [1, 1]} : vector<8x384xf32> to vector<8x32xf32>
    %167 = vector.extract_strided_slice %157 {offsets = [0, 128], sizes = [8, 32], strides = [1, 1]} : vector<8x384xf32> to vector<8x32xf32>
    %168 = arith.addf %166, %167 : vector<8x32xf32>
    %169 = arith.negf %168 : vector<8x32xf32>
    %170 = math.exp %169 : vector<8x32xf32>
    %cst_30 = arith.constant 1.000000e+00 : f32
    %171 = vector.broadcast %cst_30 : f32 to vector<8x32xf32>
    %172 = arith.addf %171, %170 : vector<8x32xf32>
    %173 = arith.divf %171, %172 : vector<8x32xf32>
    %174 = vector.extract_strided_slice %156 {offsets = [0, 256], sizes = [8, 32], strides = [1, 1]} : vector<8x384xf32> to vector<8x32xf32>
    %175 = vector.extract_strided_slice %157 {offsets = [0, 256], sizes = [8, 32], strides = [1, 1]} : vector<8x384xf32> to vector<8x32xf32>
    %176 = vector.broadcast %4 : vector<1x32xf32> to vector<8x32xf32>
    %177 = arith.addf %175, %176 : vector<8x32xf32>
    %178 = arith.mulf %165, %177 : vector<8x32xf32>
    %179 = arith.addf %174, %178 : vector<8x32xf32>
    %180 = math.tanh %179 : vector<8x32xf32>
    %cst_31 = arith.constant 1.000000e+00 : f32
    %181 = vector.broadcast %cst_31 : f32 to vector<8x32xf32>
    %182 = arith.subf %181, %173 : vector<8x32xf32>
    %183 = arith.mulf %182, %180 : vector<8x32xf32>
    %184 = arith.mulf %173, %155 : vector<8x32xf32>
    %185 = arith.addf %183, %184 : vector<8x32xf32>
    %c0_32 = arith.constant 0 : index
    %c0_33 = arith.constant 0 : index
    %186 = vector.load %arg2[%c0_32, %c0_33] : memref<64x32xf32, #tpu.memory_space<vmem>>, vector<64x32xf32>
    %c0_34 = arith.constant 0 : index
    %c768 = arith.constant 768 : index
    %187 = vector.load %arg3[%c0_34, %c768] : memref<40x1024xf32, #tpu.memory_space<vmem>>, vector<32x128xf32>
    %cst_35 = arith.constant dense<0.000000e+00> : vector<64x128xf32>
    %188 = tpu.matmul %186, %187, %cst_35 {dimension_numbers = #tpu.dot_dimension_numbers<[1], [0], [0], [1], [0, 0, 1, 1], [], []>} : vector<64x32xf32>, vector<32x128xf32>, vector<64x128xf32> -> vector<64x128xf32>
    %c0_36 = arith.constant 0 : index
    %c896 = arith.constant 896 : index
    %189 = vector.load %arg3[%c0_36, %c896] : memref<40x1024xf32, #tpu.memory_space<vmem>>, vector<32x128xf32>
    %cst_37 = arith.constant dense<0.000000e+00> : vector<8x128xf32>
    %190 = tpu.matmul %185, %189, %cst_37 {dimension_numbers = #tpu.dot_dimension_numbers<[1], [0], [0], [1], [0, 0, 1, 1], [], []>} : vector<8x32xf32>, vector<32x128xf32>, vector<8x128xf32> -> vector<8x128xf32>
    %191 = vector.shape_cast %188 : vector<64x128xf32> to vector<8x8x128xf32>
    %192 = vector.shape_cast %190 : vector<8x128xf32> to vector<1x8x128xf32>
    %193 = vector.broadcast %192 : vector<1x8x128xf32> to vector<8x8x128xf32>
    %194 = arith.addf %191, %193 : vector<8x8x128xf32>
    %195 = math.tanh %194 : vector<8x8x128xf32>
    %c1 = arith.constant 1 : index
    %c0_38 = arith.constant 0 : index
    %196 = vector.load %arg4[%c1, %c0_38] : memref<2x128xf32, #tpu.memory_space<vmem>>, vector<1x128xf32>
    %197 = vector.shape_cast %196 : vector<1x128xf32> to vector<1x1x128xf32>
    %198 = vector.broadcast %197 : vector<1x1x128xf32> to vector<8x8x128xf32>
    %199 = arith.mulf %195, %198 : vector<8x8x128xf32>
    %cst_39 = arith.constant dense<0.000000e+00> : vector<8x8xf32>
    %200 = vector.multi_reduction <add>, %199, %cst_39 [2] : vector<8x8x128xf32> to vector<8x8xf32>
    %c0_40 = arith.constant 0 : index
    %c0_41 = arith.constant 0 : index
    %201 = vector.load %arg5[%c0_40, %c0_41] : memref<8x8xf32, #tpu.memory_space<vmem>>, vector<8x8xf32>
    tpu.vector_store %arg5[%c0_40, %c0_41], %200 {strides = array<i32>} : memref<8x8xf32, #tpu.memory_space<vmem>>, vector<8x8xf32>,
    return
  }
}

</mosaic_0001>

<bundles_post_ra>
// kernel: decoder_forward.1
= control target key start
LH: loop header
LB: loop body
LE: loop exit
PB: predicated region body
PF: predicated region fallthrough
CT: control target
= control target key end

     0   :  { %10 = vsyncpa [#allocation3], 0  ;;  %s2378_s0 = inlined_call_operand.vmem [shape: f32[48,40], index: 0, kind: input, shape index: {}]   ;;  %s2379_s1 = inlined_call_operand.vmem [shape: f32[8,32], index: 1, kind: input, shape index: {}]   ;;  %s2380_s2 = inlined_call_operand.hbm [shape: f32[64,32], index: 2, kind: input, shape index: {}]   ;;  %s2381_s3 = inlined_call_operand.vmem [shape: f32[40,1024], index: 3, kind: input, shape index: {}]   ;;  %s2382_s4 = inlined_call_operand.vmem [shape: f32[2,128], index: 4, kind: input, shape index: {}]   ;;  %s2383_s5 = inlined_call_operand.hbm [shape: f32[8,8], index: 5, kind: output, shape index: {}]  }
   0x1   :  { %11 = vsyncpa [#allocation4], 0  ;;  %s1970_s18 = smov [#allocation2]  }
   0x2   :  { %s21_s19 = sshll.u32 %s1970_s18, 4  ;;  %s22_s19 = int_to_ptr.vmem [resolvable:$true] %s21_s19 }
   0x3   :  { %s1934_s20 = scalar_lea.vmem %s22_s19, 1024  ;;  %p1939_p1 = scmp.lt.s32.totalorder %s22_s19, %s22_s19 }
   0x4   :  { %p1935_p0 = scmp.ne.s32.totalorder %s22_s19, %s1934_s20  ;;  %p1940_p2 = scmp.lt.s32.totalorder %s1934_s20, %s1934_s20 }
   0x6   :  { %p1941_p3 = por %p1940_p2, %p1939_p1 }
   0x8   :  { %p1942_p4 = pnand %p1941_p3, %p1935_p0 }
   0xa   :  { %1945 = shalt.err (!%p1942_p4)
}
   0xb   :  { %s1971_s21 = smov 128   ;;  %s1972_s22 = smov 8  }
   0xc   :  { %27 = dma.hbm_to_vmem [thread:$0]  %s2380_s2, 1024, %s22_s19, [#allocation3], %s1971_s21, %s1971_s21, %s1972_s22  }
   0xd   :  { %1966 = dma.done.wait [#allocation3], 1024  }
   0xe   :  { %1967 = vsyncadd [#allocation3], 4294966272  ;;  %v1973_v0 = vmov 0.0   ;;  %vm56_vm0 = vcmask 326656   ;;  %v55_v1 = vld [vmem:[%s2381_s3 + $0x110] sm:$0xff]  ;;  %v35_v3 = vld [vmem:[%s2378_s0] sm:$0xff] }
   0xf   :  { %139 = vmatprep.mubr.f32.mxu0 %v1973_v0  ;;  %v52_v2 = vld [vmem:[%s2381_s3 + $0xd0] sm:$0xff]  ;;  %1728 = vmatprep.subr.mxu1 %v55_v1  ;;  %v54_v5 = vld [vmem:[%s2381_s3 + $0x108] sm:$0xff]  ;;  %v53_v6 = vld [vmem:[%s2381_s3 + $0x100] sm:$0xff]  ;;  %vm285_vm1 = vcmask 261120   ;;  %vm1974_vm2 = vmmov 0   ;;  %vm1591_vm3 = vcmask 1041409  }
  0x10   :  { %1729 = vmatpush3.msra.mxu1 %v55_v1  ;;  %v49_v4 = vld [vmem:[%s2381_s3 + $0x90] sm:$0xff]  ;;  %1738 = vmatprep.mubr.msk.f32.mxu1 %vm56_vm0, %v35_v3  ;;  %v51_v7 = vld [vmem:[%s2381_s3 + $0xc8] sm:$0xff]  ;;  %v50_v9 = vld [vmem:[%s2381_s3 + $0xc0] sm:$0xff]  ;;  %vm1593_vm4 = vcmask 1042434   ;;  %vm1595_vm5 = vcmask 1043459   ;;  %vm1597_vm6 = vcmask 1044484  }
  0x11   :  { %1730 = vmatprep.subr.mxu1 %v52_v2  ;;  %97 = vmatprep.subr.mxu0 %v54_v5  ;;  %v46_v8 = vld [vmem:[%s2381_s3 + $0x50] sm:$0xff]  ;;  %v48_v10 = vld [vmem:[%s2381_s3 + $0x88] sm:$0xff]  ;;  %v47_v12 = vld [vmem:[%s2381_s3 + $0x80] sm:$0xff]  ;;  %vm1599_vm7 = vcmask 1045509   ;;  %vm1601_vm8 = vcmask 1046534   ;;  %vm1603_vm9 = vcmask 1047559  }
  0x12   :  { %1731 = vmatpush3.msra.mxu1 %v52_v2  ;;  %98 = vmatpush1.msra.mxu0 %v53_v6  ;;  %v43_v11 = vld [vmem:[%s2381_s3 + $0x10] sm:$0xff]  ;;  %v45_v13 = vld [vmem:[%s2381_s3 + $0x48] sm:$0xff]  ;;  %v44_v14 = vld [vmem:[%s2381_s3 + $0x40] sm:$0xff]  ;;  %vm1606_vm10 = vcmask 64512  }
  0x13   :  { %1732 = vmatprep.subr.mxu1 %v49_v4  ;;  %99 = vmatprep.subr.mxu0 %v51_v7  ;;  %v36_v15 = vld [vmem:[%s2378_s0 + $0x8] sm:$0xff]  ;;  %v2059_v16 = vld [vmem:[%s2381_s3 + $0xe0] sm:$0xff]  ;;  %v2064_v17 = vld [vmem:[%s2381_s3 + $0xd8] sm:$0xff] }
  0x14   :  { %1733 = vmatpush3.msra.mxu1 %v49_v4  ;;  %100 = vmatpush1.msra.mxu0 %v50_v9  ;;  %v37_v18 = vld [vmem:[%s2378_s0 + $0x10] sm:$0xff]  ;;  %v2072_v19 = vld [vmem:[%s2381_s3 + $0xa0] sm:$0xff]  ;;  %v42_v20 = vld [vmem:[%s2381_s3 + $0x8] sm:$0xff] }
  0x15   :  { %1734 = vmatprep.subr.mxu1 %v46_v8  ;;  %101 = vmatprep.subr.mxu0 %v48_v10  ;;  %v2082_v21 = vld [vmem:[%s2381_s3 + $0x98] sm:$0xff]  ;;  %v41_v22 = vld [vmem:[%s2381_s3] sm:$0xff]  ;;  %v40_v29 = vld [vmem:[%s2378_s0 + $0x28] sm:$0xff] }
  0x16   :  { %1735 = vmatpush3.msra.mxu1 %v46_v8  ;;  %102 = vmatpush1.msra.mxu0 %v47_v12  ;;  %v38_v23 = vld [vmem:[%s2378_s0 + $0x18] sm:$0xff]  ;;  %v2095_v24 = vld [vmem:[%s2381_s3 + $0x60] sm:$0xff]  ;;  %v2140_v31 = vld [vmem:[%s2381_s3 + $0xe8] sm:$0xff] }
  0x17   :  { %1736 = vmatprep.subr.mxu1 %v43_v11  ;;  %103 = vmatprep.subr.mxu0 %v45_v13  ;;  %v39_v25 = vld [vmem:[%s2378_s0 + $0x20] sm:$0xff]  ;;  %v2104_v26 = vld [vmem:[%s2381_s3 + $0x58] sm:$0xff]  ;;  %v2150_v32 = vld [vmem:[%s2381_s3 + $0xa8] sm:$0xff] }
  0x18   :  { %1737 = vmatpush3.msra.mxu1 %v43_v11  ;;  %104 = vmatpush1.msra.mxu0 %v44_v14  ;;  %v2110_v27 = vld [vmem:[%s2381_s3 + $0x20] sm:$0xff]  ;;  %v2117_v28 = vld [vmem:[%s2381_s3 + $0x18] sm:$0xff]  ;;  %v2160_v33 = vld [vmem:[%s2381_s3 + $0x68] sm:$0xff] }
  0x19   :  { %1739 = vmatmul.mubr.msk.f32.vlgmr.msra.gmra.mxu1 %vm56_vm0, %v36_v15  ;;  %313 = vmatprep.subr.mxu1 %v2059_v16  ;;  %v2134_v30 = vld [vmem:[%s2379_s1] sm:$0xff]  ;;  %v2169_v34 = vld [vmem:[%s2381_s3 + $0x28] sm:$0xff] }
  0x1a   :  { %314 = vmatpush1.msra.mxu1 %v2064_v17  ;;  %1741 = vmatprep.mubr.msk.f32.mxu1 %vm56_vm0, %v37_v18  ;;  %v2212_v54 = vld [vmem:[%s2382_s4] ss:$0 sm:$0xff] }
  0x1b   :  { %315 = vmatprep.subr.mxu1 %v2072_v19  ;;  %105 = vmatprep.subr.mxu0 %v42_v20 }
  0x1c   :  { %316 = vmatpush1.msra.mxu1 %v2082_v21  ;;  %106 = vmatpush1.msra.mxu0 %v41_v22 }
  0x1d   :  { %1742 = vmatmul.mubr.msk.f32.gmra.mxu1 %vm56_vm0, %v38_v23  ;;  %317 = vmatprep.subr.mxu1 %v2095_v24 }
  0x1e   :  { %1744 = vmatprep.mubr.msk.f32.mxu1 %vm56_vm0, %v39_v25  ;;  %318 = vmatpush1.msra.mxu1 %v2104_v26 }
  0x1f   :  { %319 = vmatprep.subr.mxu1 %v2110_v27  ;;  %1623 = vmatmul.mubr.msk.f32.vlgmr.msra.gmra.mxu0 %vm56_vm0, %v35_v3 }
  0x20   :  { %320 = vmatpush1.msra.mxu1 %v2117_v28  ;;  %483 = vmatprep.subr.mxu0 %v2059_v16 }
  0x21   :  { %1745 = vmatmul.mubr.msk.f32.gmra.mxu1 %vm56_vm0, %v40_v29  ;;  %1747 = vmatprep.subr.mxu1 %v1973_v0 }
  0x22   :  { %353 = vmatprep.mubr.f32.mxu1 %v1973_v0  ;;  %484 = vmatpush1.msra.mxu0 %v2064_v17 }
  0x23   :  { %145 = vmatprep.mubr.f32.mxu0 %v1973_v0  ;;  %485 = vmatprep.subr.mxu0 %v2072_v19 }
  0x24   :  { %1624 = vmatmul.mubr.msk.f32.gmra.mxu0 %vm56_vm0, %v36_v15 }
  0x25   :  { %1635 = vmatmul.mubr.msk.f32.vlgmr.msra.gmra.mxu1 %vm285_vm1, %v2134_v30  ;;  %151 = vmatprep.mubr.f32.mxu0 %v1973_v0 }
  0x26   :  { %1748 = vmatpush3.msra.mxu1 %v2140_v31  ;;  %1755 = vmatprep.mubr.msk.f32.mxu1 %vm1974_vm2, %v1973_v0 }
  0x27   :  { %1749 = vmatprep.subr.mxu1 %v1973_v0  ;;  %486 = vmatpush1.msra.mxu0 %v2082_v21 }
  0x28   :  { %1750 = vmatpush3.msra.mxu1 %v2150_v32  ;;  %1625 = vmatmul.mubr.msk.f32.gmra.mxu0 %vm56_vm0, %v37_v18 }
  0x29   :  { %1751 = vmatprep.subr.mxu1 %v1973_v0  ;;  %157 = vmatprep.mubr.f32.mxu0 %v1973_v0 }
  0x2a   :  { %1752 = vmatpush3.msra.mxu1 %v2160_v33  ;;  %487 = vmatprep.subr.mxu0 %v2095_v24 }
  0x2b   :  { %1753 = vmatprep.subr.mxu1 %v1973_v0  ;;  %488 = vmatpush1.msra.mxu0 %v2104_v26 }
  0x2c   :  { %1754 = vmatpush3.msra.mxu1 %v2169_v34  ;;  %1626 = vmatmul.mubr.msk.f32.gmra.mxu0 %vm56_vm0, %v38_v23 }
  0x2d   :  { %1756 = vmatmul.mubr.msk.f32.vlgmr.msra.gmra.mxu1 %vm285_vm1, %v2134_v30  ;;  %163 = vmatprep.mubr.f32.mxu0 %v1973_v0 }
  0x2e   :  { %1758 = vmatprep.subr.mxu1 %v1973_v0  ;;  %489 = vmatprep.subr.mxu0 %v2110_v27 }
  0x2f   :  { %1759 = vmatpush3.msra.mxu1 %v2140_v31  ;;  %490 = vmatpush1.msra.mxu0 %v2117_v28 }
  0x30   :  { %1627 = vmatmul.mubr.msk.f32.gmra.mxu0 %vm56_vm0, %v39_v25  ;;  %1760 = vmatprep.subr.mxu1 %v1973_v0 }
  0x31   :  { %169 = vmatprep.mubr.f32.mxu0 %v1973_v0  ;;  %1761 = vmatpush3.msra.mxu1 %v2150_v32 }
  0x32   :  { %1762 = vmatprep.subr.mxu1 %v1973_v0  ;;  %1766 = vmatprep.mubr.msk.f32.mxu1 %vm1974_vm2, %v1973_v0 }
  0x33   :  { %1763 = vmatpush3.msra.mxu1 %v2160_v33  ;;  %649 = vmatprep.subr.mxu0 %v2059_v16 }
  0x34   :  { %1628 = vmatmul.mubr.msk.f32.gmra.mxu0 %vm56_vm0, %v40_v29  ;;  %1764 = vmatprep.subr.mxu1 %v1973_v0 }
  0x35   :  { %523 = vmatprep.mubr.f32.mxu0 %v1973_v0  ;;  %1765 = vmatpush3.msra.mxu1 %v2169_v34 }
  0x36   :  { %1769 = vmatprep.subr.mxu1 %v1973_v0 }
  0xd9   :  { %v2199_v35 = vpop.f32.mrf.mxu1 }
  0xdb   :  { %v242_v36 = vpop.f32.mrf.mxu1 }
  0xdd   :  { %v2201_v37 = vpop.f32.mrf.mxu1 }
  0xdf   :  { %v2203_v38 = vpop.f32.mrf.mxu1  ;;  %v141_v41 = vpop.f32.mrf.mxu0 }
  0xe1   :  { %v2205_v39 = vpop.f32.mrf.mxu1  ;;  %v143_v46 = vpop.f32.mrf.mxu0 }
  0xe3   :  { %v2207_v40 = vpop.f32.mrf.mxu1 }
  0xe4   :  { %v147_v3 = vpop.f32.mrf.mxu0 }
  0xe5   :  { %v355_v42 = vpop.f32.mrf.mxu1 }
  0xe6   :  { %v430_v43 = vadd.f32 %v355_v42, %v141_v41  ;;  %v149_v4 = vpop.f32.mrf.mxu0 }
  0xe7   :  { %v357_v45 = vpop.f32.mrf.mxu1 }
  0xe8   :  { %v1637_v44 = vmul.f32 -1.442695, %v430_v43  ;;  %v437_v47 = vadd.f32 %v357_v45, %v143_v46  ;;  %v153_v5 = vpop.f32.mrf.mxu0 }
  0xea   :  { %1850 = vpow2.f32 %v1637_v44  ;;  %v1638_v50 = vmul.f32 -1.442695, %v437_v47  ;;  %v155_v6 = vpop.f32.mrf.mxu0 }
  0xec   :  { %1852 = vpow2.f32 %v1638_v50  ;;  %v2237_v7 = vpop.f32.mrf.mxu0 }
  0xed   :  { %v426_v48 = vpop.f32.mrf.mxu1 }
  0xee   :  { %v448_v56 = vadd.f32 %v2212_v54, %v426_v48  ;;  %v2239_v8 = vpop.f32.mrf.mxu0 }
  0xef   :  { %v1757_v49 = vpop.f32.mrf.mxu1 }
  0xf0   :  { %v2241_v9 = vpop.f32.mrf.mxu0 }
  0xf2   :  { %v2243_v10 = vpop.f32.mrf.mxu0 }
  0xf4   :  { %v2245_v11 = vpop.f32.mrf.mxu0 }
  0xf6   :  { %v2247_v12 = vpop.f32.mrf.mxu0 }
  0xf7   :  { %v1851_v51 = vpop.eup %1850 }
  0xf8   :  { %v434_v52 = vadd.f32 1.0, %v1851_v51 }
  0xf9   :  { %v1853_v53 = vpop.eup %1852 }
  0xfa   :  { %1854 = vrcp.f32 %v434_v52  ;;  %v441_v55 = vadd.f32 1.0, %v1853_v53 }
  0xfc   :  { %1856 = vrcp.f32 %v441_v55 }
 0x107   :  { %v1855_v57 = vpop.eup %1854 }
 0x108   :  { %v449_v58 = vmul.f32 %v1855_v57, %v448_v56 }
 0x109   :  { %v1857_v60 = vpop.eup %1856 }
 0x10a   :  { %v450_v59 = vadd.f32 %v449_v58, %v242_v36  ;;  %v452_v61 = vsub.f32 1.0, %v1857_v60  ;;  %v454_v1 = vmul.f32 %v1857_v60, %v2134_v30 }
 0x10c   :  { %1858 = vtanh.f32 %v450_v59 }
 0x119   :  { %v1859_v62 = vpop.eup %1858 }
 0x11a   :  { %v453_v63 = vmul.f32 %v1859_v62, %v452_v61 }
 0x11c   :  { %v455_v2 = vadd.f32 %v454_v1, %v453_v63 }
 0x11e   :  { %1640 = vmatmul.mubr.msk.f32.vlgmr.msra.gmra.mxu0 %vm285_vm1, %v455_v2  ;;  %1767 = vmatmul.mubr.msk.f32.vlgmr.msra.gmra.mxu1 %vm285_vm1, %v455_v2 }
 0x11f   :  { %650 = vmatpush1.msra.mxu0 %v2064_v17  ;;  %1770 = vmatpush3.msra.mxu1 %v2140_v31 }
 0x120   :  { %651 = vmatprep.subr.mxu0 %v2072_v19  ;;  %1771 = vmatprep.subr.mxu1 %v1973_v0 }
 0x121   :  { %652 = vmatpush1.msra.mxu0 %v2082_v21  ;;  %1772 = vmatpush3.msra.mxu1 %v2150_v32 }
 0x122   :  { %653 = vmatprep.subr.mxu0 %v2095_v24  ;;  %1773 = vmatprep.subr.mxu1 %v1973_v0 }
 0x123   :  { %654 = vmatpush1.msra.mxu0 %v2104_v26  ;;  %1774 = vmatpush3.msra.mxu1 %v2160_v33 }
 0x124   :  { %655 = vmatprep.subr.mxu0 %v2110_v27  ;;  %1775 = vmatprep.subr.mxu1 %v1973_v0 }
 0x125   :  { %656 = vmatpush1.msra.mxu0 %v2117_v28  ;;  %689 = vmatprep.mubr.f32.mxu0 %v1973_v0 }
 0x126   :  { %1776 = vmatpush3.msra.mxu1 %v2169_v34  ;;  %1777 = vmatprep.mubr.msk.f32.mxu1 %vm1974_vm2, %v1973_v0 }
 0x127   :  { %815 = vmatprep.subr.mxu0 %v2059_v16  ;;  %1780 = vmatprep.subr.mxu1 %v1973_v0 }
 0x1de   :  { %v525_v13 = vpop.f32.mrf.mxu0  ;;  %v596_v14 = vpop.f32.mrf.mxu1 }
 0x1df   :  { %v600_v15 = vadd.f32 %v525_v13, %v147_v3  ;;  %v614_v42 = vadd.f32 %v2212_v54, %v596_v14 }
 0x1e0   :  { %v1768_v18 = vpop.f32.mrf.mxu1  ;;  %v527_v22 = vpop.f32.mrf.mxu0 }
 0x1e1   :  { %v1642_v20 = vmul.f32 -1.442695, %v600_v15  ;;  %v607_v23 = vadd.f32 %v527_v22, %v149_v4 }
 0x1e3   :  { %1860 = vpow2.f32 %v1642_v20  ;;  %v1643_v25 = vmul.f32 -1.442695, %v607_v23 }
 0x1e5   :  { %1862 = vpow2.f32 %v1643_v25 }
 0x1f0   :  { %v1861_v29 = vpop.eup %1860 }
 0x1f1   :  { %v604_v30 = vadd.f32 1.0, %v1861_v29 }
 0x1f2   :  { %v1863_v36 = vpop.eup %1862 }
 0x1f3   :  { %1864 = vrcp.f32 %v604_v30  ;;  %v611_v41 = vadd.f32 1.0, %v1863_v36 }
 0x1f5   :  { %1866 = vrcp.f32 %v611_v41 }
 0x200   :  { %v1865_v43 = vpop.eup %1864 }
 0x201   :  { %v615_v44 = vmul.f32 %v1865_v43, %v614_v42 }
 0x202   :  { %v1867_v46 = vpop.eup %1866 }
 0x203   :  { %v616_v45 = vadd.f32 %v2199_v35, %v615_v44  ;;  %v618_v47 = vsub.f32 1.0, %v1867_v46  ;;  %v620_v50 = vmul.f32 %v1867_v46, %v455_v2 }
 0x205   :  { %1868 = vtanh.f32 %v616_v45 }
 0x212   :  { %v1869_v48 = vpop.eup %1868 }
 0x213   :  { %v619_v49 = vmul.f32 %v1869_v48, %v618_v47 }
 0x215   :  { %v621_v51 = vadd.f32 %v620_v50, %v619_v49 }
 0x217   :  { %1644 = vmatmul.mubr.msk.f32.vlgmr.msra.gmra.mxu0 %vm285_vm1, %v621_v51  ;;  %1778 = vmatmul.mubr.msk.f32.vlgmr.msra.gmra.mxu1 %vm285_vm1, %v621_v51 }
 0x218   :  { %816 = vmatpush1.msra.mxu0 %v2064_v17  ;;  %1781 = vmatpush3.msra.mxu1 %v2140_v31 }
 0x219   :  { %817 = vmatprep.subr.mxu0 %v2072_v19  ;;  %1782 = vmatprep.subr.mxu1 %v1973_v0 }
 0x21a   :  { %818 = vmatpush1.msra.mxu0 %v2082_v21  ;;  %1783 = vmatpush3.msra.mxu1 %v2150_v32 }
 0x21b   :  { %819 = vmatprep.subr.mxu0 %v2095_v24  ;;  %1784 = vmatprep.subr.mxu1 %v1973_v0 }
 0x21c   :  { %820 = vmatpush1.msra.mxu0 %v2104_v26  ;;  %1785 = vmatpush3.msra.mxu1 %v2160_v33 }
 0x21d   :  { %821 = vmatprep.subr.mxu0 %v2110_v27  ;;  %1786 = vmatprep.subr.mxu1 %v1973_v0 }
 0x21e   :  { %822 = vmatpush1.msra.mxu0 %v2117_v28  ;;  %855 = vmatprep.mubr.f32.mxu0 %v1973_v0 }
 0x21f   :  { %1787 = vmatpush3.msra.mxu1 %v2169_v34  ;;  %1788 = vmatprep.mubr.msk.f32.mxu1 %vm1974_vm2, %v1973_v0 }
 0x220   :  { %981 = vmatprep.subr.mxu0 %v2059_v16  ;;  %1791 = vmatprep.subr.mxu1 %v1973_v0 }
 0x2d7   :  { %v691_v35 = vpop.f32.mrf.mxu0  ;;  %v762_v52 = vpop.f32.mrf.mxu1 }
 0x2d8   :  { %v766_v53 = vadd.f32 %v691_v35, %v153_v5  ;;  %v780_v1 = vadd.f32 %v2212_v54, %v762_v52 }
 0x2d9   :  { %v1779_v55 = vpop.f32.mrf.mxu1  ;;  %v693_v57 = vpop.f32.mrf.mxu0 }
 0x2da   :  { %v1646_v56 = vmul.f32 -1.442695, %v766_v53  ;;  %v773_v58 = vadd.f32 %v693_v57, %v155_v6 }
 0x2dc   :  { %1870 = vpow2.f32 %v1646_v56  ;;  %v1647_v59 = vmul.f32 -1.442695, %v773_v58 }
 0x2de   :  { %1872 = vpow2.f32 %v1647_v59 }
 0x2e9   :  { %v1871_v60 = vpop.eup %1870 }
 0x2ea   :  { %v770_v61 = vadd.f32 1.0, %v1871_v60  ;;  %v1296_v60 = vld [vmem:[%s2381_s3 + $0xb0] sm:$0xff] }
 0x2eb   :  { %v1873_v62 = vpop.eup %1872 }
 0x2ec   :  { %1874 = vrcp.f32 %v770_v61  ;;  %v777_v63 = vadd.f32 1.0, %v1873_v62  ;;  %v1295_v61 = vld [vmem:[%s2381_s3 + $0x70] sm:$0xff] }
 0x2ed   :  { %v1294_v62 = vld [vmem:[%s2381_s3 + $0x30] sm:$0xff] }
 0x2ee   :  { %1876 = vrcp.f32 %v777_v63  ;;  %v1286_v63 = vld [vmem:[#allocation2] sm:$0xff] }
 0x2f9   :  { %v1875_v2 = vpop.eup %1874 }
 0x2fa   :  { %v781_v3 = vmul.f32 %v1875_v2, %v780_v1  ;;  %v1287_v1 = vld [vmem:[#allocation2 + $0x8] sm:$0xff]  ;;  %v1288_v2 = vld [vmem:[#allocation2 + $0x10] sm:$0xff] }
 0x2fb   :  { %v1877_v5 = vpop.eup %1876 }
 0x2fc   :  { %v782_v4 = vadd.f32 %v781_v3, %v2203_v38  ;;  %v784_v13 = vsub.f32 1.0, %v1877_v5  ;;  %v786_v6 = vmul.f32 %v1877_v5, %v621_v51  ;;  %v1430_v3 = vld [vmem:[%s2381_s3 + $0xf8] sm:$0xff] }
 0x2fd   :  { %v1428_v5 = vld [vmem:[%s2381_s3 + $0x78] sm:$0xff] }
 0x2fe   :  { %1878 = vtanh.f32 %v782_v4  ;;  %v1429_v4 = vld [vmem:[%s2381_s3 + $0xb8] sm:$0xff] }
 0x30b   :  { %v1879_v14 = vpop.eup %1878 }
 0x30c   :  { %v785_v15 = vmul.f32 %v1879_v14, %v784_v13  ;;  %v1289_v13 = vld [vmem:[#allocation2 + $0x18] sm:$0xff]  ;;  %v1290_v14 = vld [vmem:[#allocation2 + $0x20] sm:$0xff] }
 0x30e   :  { %v787_v18 = vadd.f32 %v786_v6, %v785_v15  ;;  %v1427_v15 = vld [vmem:[%s2381_s3 + $0x38] sm:$0xff]  ;;  %v1291_v6 = vld [vmem:[#allocation2 + $0x28] sm:$0xff] }
 0x310   :  { %1648 = vmatmul.mubr.msk.f32.vlgmr.msra.gmra.mxu0 %vm285_vm1, %v787_v18  ;;  %1789 = vmatmul.mubr.msk.f32.vlgmr.msra.gmra.mxu1 %vm285_vm1, %v787_v18 }
 0x311   :  { %982 = vmatpush1.msra.mxu0 %v2064_v17  ;;  %1792 = vmatpush3.msra.mxu1 %v2140_v31 }
 0x312   :  { %983 = vmatprep.subr.mxu0 %v2072_v19  ;;  %1793 = vmatprep.subr.mxu1 %v1973_v0 }
 0x313   :  { %984 = vmatpush1.msra.mxu0 %v2082_v21  ;;  %1794 = vmatpush3.msra.mxu1 %v2150_v32 }
 0x314   :  { %985 = vmatprep.subr.mxu0 %v2095_v24  ;;  %1795 = vmatprep.subr.mxu1 %v1973_v0 }
 0x315   :  { %986 = vmatpush1.msra.mxu0 %v2104_v26  ;;  %1796 = vmatpush3.msra.mxu1 %v2160_v33 }
 0x316   :  { %987 = vmatprep.subr.mxu0 %v2110_v27  ;;  %1797 = vmatprep.subr.mxu1 %v1973_v0 }
 0x317   :  { %988 = vmatpush1.msra.mxu0 %v2117_v28  ;;  %1021 = vmatprep.mubr.f32.mxu0 %v1973_v0 }
 0x318   :  { %1798 = vmatpush3.msra.mxu1 %v2169_v34  ;;  %1799 = vmatprep.mubr.msk.f32.mxu1 %vm1974_vm2, %v1973_v0 }
 0x319   :  { %1147 = vmatprep.subr.mxu0 %v2059_v16  ;;  %1802 = vmatprep.subr.mxu1 %v1973_v0 }
 0x3d0   :  { %v857_v38 = vpop.f32.mrf.mxu0  ;;  %v928_v20 = vpop.f32.mrf.mxu1 }
 0x3d1   :  { %v932_v22 = vadd.f32 %v857_v38, %v2237_v7  ;;  %v946_v16 = vadd.f32 %v2212_v54, %v928_v20  ;;  %v1293_v38 = vld [vmem:[#allocation2 + $0x38] sm:$0xff] }
 0x3d2   :  { %v1790_v23 = vpop.f32.mrf.mxu1  ;;  %v859_v29 = vpop.f32.mrf.mxu0 }
 0x3d3   :  { %v1650_v25 = vmul.f32 -1.442695, %v932_v22  ;;  %v939_v30 = vadd.f32 %v859_v29, %v2239_v8 }
 0x3d5   :  { %1880 = vpow2.f32 %v1650_v25  ;;  %v1651_v36 = vmul.f32 -1.442695, %v939_v30 }
 0x3d7   :  { %1882 = vpow2.f32 %v1651_v36 }
 0x3e2   :  { %v1881_v41 = vpop.eup %1880 }
 0x3e3   :  { %v936_v42 = vadd.f32 1.0, %v1881_v41 }
 0x3e4   :  { %v1883_v43 = vpop.eup %1882 }
 0x3e5   :  { %1884 = vrcp.f32 %v936_v42  ;;  %v943_v44 = vadd.f32 1.0, %v1883_v43 }
 0x3e7   :  { %1886 = vrcp.f32 %v943_v44 }
 0x3f2   :  { %v1885_v45 = vpop.eup %1884 }
 0x3f3   :  { %v947_v46 = vmul.f32 %v1885_v45, %v946_v16 }
 0x3f4   :  { %v1887_v47 = vpop.eup %1886 }
 0x3f5   :  { %v948_v7 = vadd.f32 %v2201_v37, %v947_v46  ;;  %v950_v48 = vsub.f32 1.0, %v1887_v47  ;;  %v952_v8 = vmul.f32 %v1887_v47, %v787_v18  ;;  %v1292_v18 = vld [vmem:[#allocation2 + $0x30] sm:$0xff] }
 0x3f7   :  { %1888 = vtanh.f32 %v948_v7 }
 0x404   :  { %v1889_v49 = vpop.eup %1888 }
 0x405   :  { %v951_v50 = vmul.f32 %v1889_v49, %v950_v48 }
 0x407   :  { %v953_v51 = vadd.f32 %v952_v8, %v951_v50 }
 0x409   :  { %1652 = vmatmul.mubr.msk.f32.vlgmr.msra.gmra.mxu0 %vm285_vm1, %v953_v51  ;;  %1800 = vmatmul.mubr.msk.f32.vlgmr.msra.gmra.mxu1 %vm285_vm1, %v953_v51 }
 0x40a   :  { %1148 = vmatpush1.msra.mxu0 %v2064_v17  ;;  %1803 = vmatpush3.msra.mxu1 %v2140_v31 }
 0x40b   :  { %1149 = vmatprep.subr.mxu0 %v2072_v19  ;;  %1804 = vmatprep.subr.mxu1 %v1973_v0 }
 0x40c   :  { %1150 = vmatpush1.msra.mxu0 %v2082_v21  ;;  %1805 = vmatpush3.msra.mxu1 %v2150_v32 }
 0x40d   :  { %1151 = vmatprep.subr.mxu0 %v2095_v24  ;;  %1806 = vmatprep.subr.mxu1 %v1973_v0 }
 0x40e   :  { %1152 = vmatpush1.msra.mxu0 %v2104_v26  ;;  %1807 = vmatpush3.msra.mxu1 %v2160_v33 }
 0x40f   :  { %1153 = vmatprep.subr.mxu0 %v2110_v27  ;;  %1808 = vmatprep.subr.mxu1 %v1973_v0 }
 0x410   :  { %1154 = vmatpush1.msra.mxu0 %v2117_v28  ;;  %1187 = vmatprep.mubr.f32.mxu0 %v1973_v0 }
 0x411   :  { %1809 = vmatpush3.msra.mxu1 %v2169_v34  ;;  %1810 = vmatprep.mubr.msk.f32.mxu1 %vm1974_vm2, %v1973_v0 }
 0x412   :  { %1833 = vmatprep.subr.mxu1 %v1973_v0 }
 0x4c9   :  { %v1023_v17 = vpop.f32.mrf.mxu0  ;;  %v1094_v19 = vpop.f32.mrf.mxu1 }
 0x4ca   :  { %v1098_v21 = vadd.f32 %v1023_v17, %v2241_v9  ;;  %v1112_v35 = vadd.f32 %v2212_v54, %v1094_v19 }
 0x4cb   :  { %v1801_v24 = vpop.f32.mrf.mxu1  ;;  %v1025_v27 = vpop.f32.mrf.mxu0 }
 0x4cc   :  { %v1654_v26 = vmul.f32 -1.442695, %v1098_v21  ;;  %v1105_v31 = vadd.f32 %v1025_v27, %v2243_v10 }
 0x4ce   :  { %1890 = vpow2.f32 %v1654_v26  ;;  %v1655_v28 = vmul.f32 -1.442695, %v1105_v31 }
 0x4d0   :  { %1892 = vpow2.f32 %v1655_v28 }
 0x4db   :  { %v1891_v32 = vpop.eup %1890 }
 0x4dc   :  { %v1102_v33 = vadd.f32 1.0, %v1891_v32 }
 0x4dd   :  { %v1893_v34 = vpop.eup %1892 }
 0x4de   :  { %1894 = vrcp.f32 %v1102_v33  ;;  %v1109_v37 = vadd.f32 1.0, %v1893_v34 }
 0x4e0   :  { %1896 = vrcp.f32 %v1109_v37 }
 0x4eb   :  { %v1895_v52 = vpop.eup %1894 }
 0x4ec   :  { %v1113_v53 = vmul.f32 %v1895_v52, %v1112_v35 }
 0x4ed   :  { %v1897_v55 = vpop.eup %1896 }
 0x4ee   :  { %v1114_v9 = vadd.f32 %v1113_v53, %v2207_v40  ;;  %v1116_v56 = vsub.f32 1.0, %v1897_v55  ;;  %v1118_v10 = vmul.f32 %v1897_v55, %v953_v51  ;;  %v1297_v40 = vld [vmem:[%s2381_s3 + $0xf0] sm:$0xff]  ;;  %v1669_v53 = vld [vmem:[%s2382_s4 + $0x1] ss:$0 sm:$0xff]  ;;  %s1975_s4 = smov [#allocation5]  }
 0x4ef   :  { %1813 = vmatprep.subr.mxu0 %v1297_v40  ;;  %s1614_s6 = sshll.u32 %s1975_s4, 4  ;;  %s1615_s6 = int_to_ptr.vmem [resolvable:$true] %s1614_s6 }
 0x4f0   :  { %1898 = vtanh.f32 %v1114_v9  ;;  %s1946_s0 = scalar_lea.vmem %s1615_s6, 128  ;;  %p1951_p6 = scmp.lt.s32.totalorder %s1615_s6, %s1615_s6 }
 0x4f1   :  { %p1947_p5 = scmp.ne.s32.totalorder %s1615_s6, %s1946_s0  ;;  %p1952_p7 = scmp.lt.s32.totalorder %s1946_s0, %s1946_s0 }
 0x4f3   :  { %p1953_p8 = por %p1952_p7, %p1951_p6 }
 0x4f5   :  { %p1954_p9 = pnand %p1953_p8, %p1947_p5 }
 0x4fd   :  { %v1899_v57 = vpop.eup %1898 }
 0x4fe   :  { %v1117_v58 = vmul.f32 %v1899_v57, %v1116_v56 }
 0x500   :  { %v2323_v59 = vadd.f32 %v1118_v10, %v1117_v58 }
 0x502   :  { %1656 = vmatmul.mubr.msk.f32.vlgmr.msra.gmra.mxu0 %vm285_vm1, %v2323_v59  ;;  %1811 = vmatmul.mubr.msk.f32.vlgmr.msra.gmra.mxu1 %vm285_vm1, %v2323_v59 }
 0x503   :  { %1841 = vmatprep.mubr.msk.f32.mxu1 %vm1974_vm2, %v1973_v0  ;;  %1814 = vmatpush3.msra.mxu0 %v1297_v40 }
 0x504   :  { %1815 = vmatprep.subr.mxu0 %v1296_v60  ;;  %1821 = vmatprep.mubr.msk.f32.mxu0 %vm285_vm1, %v1286_v63 }
 0x505   :  { %1816 = vmatpush3.msra.mxu0 %v1296_v60  ;;  %1834 = vmatpush3.msra.mxu1 %v1430_v3 }
 0x506   :  { %1817 = vmatprep.subr.mxu0 %v1295_v61  ;;  %1835 = vmatprep.subr.mxu1 %v1973_v0 }
 0x507   :  { %1818 = vmatpush3.msra.mxu0 %v1295_v61  ;;  %1836 = vmatpush3.msra.mxu1 %v1429_v4 }
 0x508   :  { %1819 = vmatprep.subr.mxu0 %v1294_v62  ;;  %1837 = vmatprep.subr.mxu1 %v1973_v0 }
 0x509   :  { %1820 = vmatpush3.msra.mxu0 %v1294_v62  ;;  %1838 = vmatpush3.msra.mxu1 %v1428_v5  ;;  %v1557_v5 = vlaneseq }
 0x50a   :  { %1822 = vmatmul.mubr.msk.f32.vlgmr.msra.gmra.mxu0 %vm285_vm1, %v1287_v1  ;;  %1839 = vmatprep.subr.mxu1 %v1973_v0 }
 0x50b   :  { %1824 = vmatprep.mubr.msk.f32.mxu0 %vm285_vm1, %v1288_v2  ;;  %1840 = vmatpush3.msra.mxu1 %v1427_v15 }
 0x50e   :  { %1825 = vmatmul.mubr.msk.f32.gmra.mxu0 %vm285_vm1, %v1289_v13  ;;  %v1558_v13 = vand.u32 127, %v1557_v5 }
 0x50f   :  { %1827 = vmatprep.mubr.msk.f32.mxu0 %vm285_vm1, %v1290_v14  ;;  %v1560_v14 = vshrl.u32 %v1557_v5, 7 }
 0x512   :  { %1828 = vmatmul.mubr.msk.f32.gmra.mxu0 %vm285_vm1, %v1291_v6 }
 0x513   :  { %1830 = vmatprep.mubr.msk.f32.mxu0 %vm285_vm1, %v1292_v18  ;;  %v1561_v18 = vsub.s32 %v1558_v13, %v1560_v14 }
 0x516   :  { %1831 = vmatmul.mubr.msk.f32.gmra.mxu0 %vm285_vm1, %v1293_v38 }
 0x5c2   :  { %v1189_v20 = vpop.f32.mrf.mxu0  ;;  %v1260_v22 = vpop.f32.mrf.mxu1 }
 0x5c3   :  { %v1264_v23 = vadd.f32 %v1189_v20, %v2245_v11  ;;  %v1278_v16 = vadd.f32 %v2212_v54, %v1260_v22 }
 0x5c4   :  { %v1812_v25 = vpop.f32.mrf.mxu1  ;;  %v1191_v30 = vpop.f32.mrf.mxu0 }
 0x5c5   :  { %v1658_v29 = vmul.f32 -1.442695, %v1264_v23  ;;  %v1271_v0 = vadd.f32 %v1191_v30, %v2247_v12 }
 0x5c7   :  { %1900 = vpow2.f32 %v1658_v29  ;;  %v1659_v36 = vmul.f32 -1.442695, %v1271_v0 }
 0x5c9   :  { %1902 = vpow2.f32 %v1659_v36 }
 0x5ca   :  { %v1823_v8 = vpop.f32.mrf.mxu0 }
 0x5cc   :  { %v1388_v51 = vpop.f32.mrf.mxu0 }
 0x5ce   :  { %v1826_v17 = vpop.f32.mrf.mxu0 }
 0x5d0   :  { %v1398_v19 = vpop.f32.mrf.mxu0 }
 0x5d2   :  { %v1829_v54 = vpop.f32.mrf.mxu0 }
 0x5d4   :  { %v1901_v41 = vpop.eup %1900  ;;  %v1408_v21 = vpop.f32.mrf.mxu0 }
 0x5d5   :  { %v1268_v42 = vadd.f32 1.0, %v1901_v41 }
 0x5d6   :  { %v1903_v43 = vpop.eup %1902  ;;  %v1832_v32 = vpop.f32.mrf.mxu0 }
 0x5d7   :  { %1904 = vrcp.f32 %v1268_v42  ;;  %v1275_v44 = vadd.f32 1.0, %v1903_v43 }
 0x5d8   :  { %v1418_v37 = vpop.f32.mrf.mxu0 }
 0x5d9   :  { %1906 = vrcp.f32 %v1275_v44 }
 0x5e4   :  { %v1905_v45 = vpop.eup %1904 }
 0x5e5   :  { %v1279_v46 = vmul.f32 %v1905_v45, %v1278_v16 }
 0x5e6   :  { %v1907_v7 = vpop.eup %1906 }
 0x5e7   :  { %v1280_v11 = vadd.f32 %v2205_v39, %v1279_v46  ;;  %v1282_v47 = vsub.f32 1.0, %v1907_v7  ;;  %v1284_v12 = vmul.f32 %v1907_v7, %v2323_v59 }
 0x5e9   :  { %1908 = vtanh.f32 %v1280_v11 }
 0x5f6   :  { %v1909_v48 = vpop.eup %1908 }
 0x5f7   :  { %v1283_v49 = vmul.f32 %v1909_v48, %v1282_v47 }
 0x5f9   :  { %v1285_v50 = vadd.f32 %v1284_v12, %v1283_v49 }
 0x5fb   :  { %1842 = vmatmul.mubr.msk.f32.vlgmr.msra.gmra.mxu1 %vm285_vm1, %v1285_v50 }
 0x6bb   :  { %v1500_v24 = vpop.f32.mrf.mxu1 }
 0x6bc   :  { %v1506_v26 = vadd.f32 %v1500_v24, %v1398_v19  ;;  %v1504_v27 = vadd.f32 %v1500_v24, %v1388_v51  ;;  %v1507_v39 = vadd.f32 %v1826_v17, %v1500_v24  ;;  %v1505_v28 = vadd.f32 %v1823_v8, %v1500_v24 }
 0x6bd   :  { %v1843_v31 = vpop.f32.mrf.mxu1  ;;  %v1509_v33 = vadd.f32 %v1829_v54, %v1500_v24  ;;  %v1508_v34 = vadd.f32 %v1500_v24, %v1408_v21  ;;  %v1511_v35 = vadd.f32 %v1832_v32, %v1500_v24  ;;  %v1510_v52 = vadd.f32 %v1500_v24, %v1418_v37 }
 0x6be   :  { %1910 = vtanh.f32 %v1506_v26 }
 0x6bf   :  { %1912 = vtanh.f32 %v1504_v27 }
 0x6c0   :  { %1914 = vtanh.f32 %v1507_v39 }
 0x6c1   :  { %1916 = vtanh.f32 %v1505_v28 }
 0x6c2   :  { %1918 = vtanh.f32 %v1509_v33 }
 0x6c3   :  { %1920 = vtanh.f32 %v1508_v34 }
 0x6c4   :  { %1922 = vtanh.f32 %v1511_v35 }
 0x6c5   :  { %1924 = vtanh.f32 %v1510_v52 }
 0x6cb   :  { %v1911_v9 = vpop.eup %1910 }
 0x6cc   :  { %v1913_v55 = vpop.eup %1912  ;;  %v1527_v56 = vmul.f32 %v1911_v9, %v1669_v53 }
 0x6cd   :  { %v1915_v57 = vpop.eup %1914  ;;  %v1525_v58 = vmul.f32 %v1913_v55, %v1669_v53 }
 0x6ce   :  { %v1917_v10 = vpop.eup %1916  ;;  %1537 = vadd.xlane.f32.xlu1 %v1527_v56  ;;  %v1528_v59 = vmul.f32 %v1915_v57, %v1669_v53 }
 0x6cf   :  { %1533 = vadd.xlane.f32.xlu0 %v1525_v58  ;;  %v1919_v40 = vpop.eup %1918  ;;  %v1526_v60 = vmul.f32 %v1917_v10, %v1669_v53 }
 0x6d0   :  { %v1921_v61 = vpop.eup %1920  ;;  %v1530_v62 = vmul.f32 %v1919_v40, %v1669_v53 }
 0x6d1   :  { %v1923_v63 = vpop.eup %1922  ;;  %v1529_v1 = vmul.f32 %v1921_v61, %v1669_v53 }
 0x6d2   :  { %1539 = vadd.xlane.f32.xlu1 %v1528_v59  ;;  %v1925_v2 = vpop.eup %1924  ;;  %v1532_v3 = vmul.f32 %v1923_v63, %v1669_v53 }
 0x6d3   :  { %1535 = vadd.xlane.f32.xlu0 %v1526_v60  ;;  %v1531_v4 = vmul.f32 %v1925_v2, %v1669_v53 }
 0x6d6   :  { %1543 = vadd.xlane.f32.xlu1 %v1530_v62 }
 0x6d7   :  { %1541 = vadd.xlane.f32.xlu0 %v1529_v1 }
 0x6da   :  { %1547 = vadd.xlane.f32.xlu1 %v1532_v3 }
 0x6db   :  { %1545 = vadd.xlane.f32.xlu0 %v1531_v4 }
 0x757   :  { %v1538_v15 = vpop.xlane.xlu1 %1537 }
 0x758   :  { %v1534_v6 = vpop.xlane.xlu0 %1533  ;;  %v1570_v25 = vrot.slane %v1538_v15, %v1561_v18 }
 0x759   :  { %v1562_v22 = vrot.slane %v1534_v6, %v1561_v18 }
 0x75b   :  { %v1540_v38 = vpop.xlane.xlu1 %1539 }
 0x75c   :  { %v1536_v20 = vpop.xlane.xlu0 %1535  ;;  %v1574_v29 = vrot.slane %v1540_v38, %v1561_v18 }
 0x75d   :  { %v1566_v23 = vrot.slane %v1536_v20, %v1561_v18 }
 0x75f   :  { %v1592_v30 = vsel %vm1591_vm3, %v1566_v23, %v1562_v22  ;;  %v1544_v0 = vpop.xlane.xlu1 %1543 }
 0x760   :  { %v1594_v36 = vsel %vm1593_vm4, %v1570_v25, %v1592_v30  ;;  %v1542_v41 = vpop.xlane.xlu0 %1541  ;;  %v1582_v44 = vrot.slane %v1544_v0, %v1561_v18 }
 0x761   :  { %v1596_v42 = vsel %vm1595_vm5, %v1574_v29, %v1594_v36  ;;  %v1578_v43 = vrot.slane %v1542_v41, %v1561_v18 }
 0x763   :  { %v1598_v16 = vsel %vm1597_vm6, %v1578_v43, %v1596_v42  ;;  %v1548_v45 = vpop.xlane.xlu1 %1547 }
 0x764   :  { %v1590_v46 = vrot.slane %v1548_v45, %v1561_v18  ;;  %v1546_v11 = vpop.xlane.xlu0 %1545  ;;  %v1600_v47 = vsel %vm1599_vm7, %v1582_v44, %v1598_v16 }
 0x765   :  { %v1586_v7 = vrot.slane %v1546_v11, %v1561_v18 }
 0x767   :  { %v1602_v48 = vsel %vm1601_vm8, %v1586_v7, %v1600_v47 }
 0x768   :  { %v1604_v49 = vsel %vm1603_vm9, %v1590_v46, %v1602_v48 }
 0x769   :  { %1607 = vst.msk [vmem:[#allocation5] sm:$0xff] %vm1606_vm10, %v1604_v49 }
 0x76a   :  { %1957 = shalt.err (!%p1954_p9)
}
 0x76b   :  { %1617 = dma.vmem_to_hbm [thread:$0]  %s1615_s6, 128, %s2383_s5, [#allocation4]  }
 0x76c   :  { %1968 = dma.done.wait [#allocation4], 128  }
 0x76d   :  { %1969 = vsyncadd [#allocation4], 4294967168 }
 0x76e   :  { %1621 = vsyncpa [#allocation3], 1 }
 0x76f   :  { %1622 = vsyncpa [#allocation4], 1 }

</bundles_post_ra>
